<compile_context>
chip_gen: v5e
topology: v5e:2x2
jax: 0.10.0
libtpu: 0.0.40
codegen_flags: <defaults>
</compile_context>

<pallas_src>
import jax
import jax.numpy as jnp
from jax import lax
from jax.experimental import pallas as pl
from jax.experimental.pallas import tpu as pltpu


def _round_up(x, m):
    return (x + m - 1) // m * m


def scale_prediction_kernel(x_ref, w1_ref, bn_shift_ref, w2_ref, b2_ref, o_ref):
    """One (batch, row-tile) block of the YOLO head.

    x_ref:        (1, tH*W, 9*Cin)  bf16  im2col'ed input (3x3 taps in channel axis)
    w1_ref:       (9*Cin, Cmid)     bf16  3x3 conv taps flattened, BN scale folded in
    bn_shift_ref: (1, Cmid)         f32   folded BN shift = beta - mean*scale
    w2_ref:       (Cmid, Coutp)     bf16  1x1 conv weights (Cout zero-padded to 128-mult)
    b2_ref:       (1, Coutp)        f32   1x1 conv bias (zero-padded)
    o_ref:        (1, tH*W, Coutp)  f32   output row tile (lane-dense)
    """
    # 3x3 conv (+ folded BN scale) == ONE MXU matmul over K = 9*Cin.
    y = jnp.dot(x_ref[0], w1_ref[...], preferred_element_type=jnp.float32)
    # BatchNorm shift (eval mode) + LeakyReLU(0.1), f32 elementwise.
    y = y + bn_shift_ref[...]
    y = jnp.maximum(y, 0.1 * y)
    # 1x1 conv with bias == channel matmul; lane-dense (Coutp) output store.
    out = jnp.dot(y.astype(jnp.bfloat16), w2_ref[...],
                  preferred_element_type=jnp.float32)
    o_ref[0] = out + b2_ref[...]


def scale_prediction(x_nchw, w1, bn_scale, bn_shift, w2, b2, num_classes, *, tH=8):
    """x_nchw: (B, Cin, H, W) float32, like the PyTorch module input.

    w1: (3, 3, Cin, Cmid) HWIO bias-free 3x3 weights; bn_scale/bn_shift: (1, Cmid)
    folded eval-mode BatchNorm; w2: (Cmid, Cout) 1x1 weights; b2: (1, Cout) bias.
    """
    B, Cin, H, W = x_nchw.shape
    Cmid = w1.shape[3]
    Cout = w2.shape[1]
    attrs = num_classes + 5
    assert Cout == 3 * attrs

    Hp = _round_up(H, tH)            # padded row count -> grid always has Hp//tH steps
    Coutp = _round_up(Cout, 128)     # lane-dense output channel count
    K = 9 * Cin                      # im2col contraction size

    # ---- Input glue (single fused HBM pass) --------------------------------
    # The NCHW->NHWC transpose is required by the module's input layout; the
    # halo zero-pad, 3x3 im2col and (row, col) flatten fuse into it.  bf16
    # halves input DMA and resident VMEM.
    x_nhwc = jnp.transpose(x_nchw, (0, 2, 3, 1)).astype(jnp.bfloat16)
    x_halo = jnp.pad(x_nhwc, ((0, 0), (1, 1 + (Hp - H)), (1, 1), (0, 0)))
    taps = [x_halo[:, dy:dy + Hp, dx:dx + W, :]
            for dy in range(3) for dx in range(3)]
    x_flat = jnp.concatenate(taps, axis=-1).reshape(B, Hp * W, K)

    # ---- Parameter prep (one-time constant folds) --------------------------
    # BN scale folds into the bias-free 3x3 weights; 1x1 weights/bias padded to
    # the lane-dense Coutp; matmul operands in bf16 (f32 accumulate in-kernel).
    w1f = (w1 * bn_scale.reshape(1, 1, 1, Cmid)).reshape(K, Cmid).astype(jnp.bfloat16)
    bnsh = bn_shift.reshape(1, Cmid).astype(jnp.float32)
    w2p = jnp.pad(w2, ((0, 0), (0, Coutp - Cout))).astype(jnp.bfloat16)
    b2p = jnp.pad(b2.reshape(1, Cout),
                  ((0, 0), (0, Coutp - Cout))).astype(jnp.float32)

    # ---- Grid / pipelining --------------------------------------------------
    n_row_tiles = Hp // tH
    rows_per_step = tH * W           # multiple of 8 for any W since tH == 8

    in_block = rows_per_step * K * 2
    out_block = rows_per_step * Coutp * 4
    param_bytes = w1f.size * 2 + w2p.size * 2 + bnsh.size * 4 + b2p.size * 4
    working_set = 2 * (in_block + out_block) + 2 * param_bytes   # double-buffered
    vmem_limit = int(min(32 * 1024 * 1024,
                         max(16 * 1024 * 1024, 2 * working_set + (2 << 20))))

    flops = 2 * B * Hp * W * (K * Cmid + Cmid * Coutp)
    bytes_accessed = (x_flat.size * 2 + w1f.size * 2 + w2p.size * 2 +
                      bnsh.size * 4 + b2p.size * 4 + B * Hp * W * Coutp * 4)

    out_pad = pl.pallas_call(
        scale_prediction_kernel,
        out_shape=jax.ShapeDtypeStruct((B, Hp * W, Coutp), jnp.float32),
        grid_spec=pltpu.PrefetchScalarGridSpec(
            num_scalar_prefetch=0,
            grid=(B, n_row_tiles),
            in_specs=[
                pl.BlockSpec((1, rows_per_step, K), lambda b, i: (b, i, 0)),
                pl.BlockSpec((K, Cmid), lambda b, i: (0, 0)),
                pl.BlockSpec((1, Cmid), lambda b, i: (0, 0)),
                pl.BlockSpec((Cmid, Coutp), lambda b, i: (0, 0)),
                pl.BlockSpec((1, Coutp), lambda b, i: (0, 0)),
            ],
            out_specs=pl.BlockSpec((1, rows_per_step, Coutp),
                                   lambda b, i: (b, i, 0)),
        ),
        compiler_params=pltpu.CompilerParams(
            dimension_semantics=("parallel", "parallel"),
            vmem_limit_bytes=vmem_limit),
        cost_estimate=pl.CostEstimate(flops=flops, transcendentals=0,
                                      bytes_accessed=bytes_accessed),
    )(x_flat, w1f, bnsh, w2p, b2p)

    # ---- Output glue (fuses with the mandatory permute) ---------------------
    # Drop H / channel padding and reproduce
    # reshape(B, 3, nc+5, H, W).permute(0, 1, 3, 4, 2)  (NHWC channel c == a*(nc+5)+t).
    out = out_pad.reshape(B, Hp, W, Coutp)[:, :H, :, :Cout]
    return out.reshape(B, H, W, 3, attrs).transpose(0, 3, 1, 2, 4)


def scale_prediction_ref(x_nchw, w1, bn_scale, bn_shift, w2, b2, num_classes):
    """Pure-JAX f32 reference (module semantics) for correctness check."""
    B, Cin, H, W = x_nchw.shape
    attrs = num_classes + 5
    x = jnp.transpose(x_nchw, (0, 2, 3, 1))
    y = lax.conv_general_dilated(
        x, w1, window_strides=(1, 1), padding=((1, 1), (1, 1)),
        dimension_numbers=("NHWC", "HWIO", "NHWC"))
    y = y * bn_scale[0] + bn_shift[0]
    y = jnp.where(y > 0, y, 0.1 * y)
    y = jnp.einsum("bhwc,co->bhwo", y, w2) + b2[0]
    return y.reshape(B, H, W, 3, attrs).transpose(0, 3, 1, 2, 4)


if __name__ == "__main__":
    # Small shapes consistent with ScalePrediction(in_channels=4, num_classes=3).
    B, Cin, H, W = 2, 4, 16, 16
    num_classes = 3
    Cmid = 2 * Cin
    Cout = (num_classes + 5) * 3

    key = jax.random.PRNGKey(0)
    k = jax.random.split(key, 8)

    x = jax.random.normal(k[0], (B, Cin, H, W), jnp.float32)

    # CNNBlock 1: 3x3 conv (no bias) + BatchNorm2d + LeakyReLU(0.1)
    w1 = jax.random.normal(k[1], (3, 3, Cin, Cmid), jnp.float32) * 0.1   # HWIO
    gamma = jax.random.uniform(k[2], (Cmid,), jnp.float32, 0.5, 1.5)
    beta = jax.random.normal(k[3], (Cmid,), jnp.float32) * 0.1
    run_mean = jax.random.normal(k[4], (Cmid,), jnp.float32) * 0.1
    run_var = jax.random.uniform(k[5], (Cmid,), jnp.float32, 0.5, 1.5)
    eps = 1e-5
    bn_scale = (gamma / jnp.sqrt(run_var + eps)).reshape(1, Cmid)
    bn_shift = (beta - run_mean * gamma / jnp.sqrt(run_var + eps)).reshape(1, Cmid)

    # CNNBlock 2: 1x1 conv with bias, no BN/activation.
    w2 = jax.random.normal(k[6], (Cmid, Cout), jnp.float32) * 0.1
    b2 = (jax.random.normal(k[7], (Cout,), jnp.float32) * 0.1).reshape(1, Cout)

    out = scale_prediction(x, w1, bn_scale, bn_shift, w2, b2, num_classes)
    out = jax.block_until_ready(out)

    ref = scale_prediction_ref(x, w1, bn_scale, bn_shift, w2, b2, num_classes)
    assert out.shape == (B, 3, H, W, num_classes + 5), out.shape
    # bf16 MXU inputs (f32 accumulation) vs the f32 reference -> loosened tolerance.
    assert jnp.allclose(out, ref, atol=5e-2, rtol=5e-2), "mismatch vs reference"

    print("KERNEL_OK")
</pallas_src>

<mosaic_0001>
module attributes {stable_mosaic.version = 11 : i64} {
  func.func @scale_prediction_kernel(%arg0: i32, %arg1: i32, %arg2: memref<1x128x36xbf16, #tpu.memory_space<vmem>>, %arg3: memref<36x8xbf16, #tpu.memory_space<vmem>>, %arg4: memref<1x8xf32, #tpu.memory_space<vmem>>, %arg5: memref<8x128xbf16, #tpu.memory_space<vmem>>, %arg6: memref<1x128xf32, #tpu.memory_space<vmem>>, %arg7: memref<1x128x128xf32, #tpu.memory_space<vmem>>) attributes {dimension_semantics = [#tpu.dimension_semantics<parallel>, #tpu.dimension_semantics<parallel>], iteration_bounds = array<i64: 2, 2>, scalar_prefetch = 0 : i64, scratch_operands = 0 : i64, tpu.core_type = #tpu.core_type<tc>, window_params = [{transform_indices = @transform_0, window_bounds = array<i64: 1, 128, 36>}, {pipeline_mode = #tpu.pipeline_mode<synchronous>, transform_indices = @transform_1, window_bounds = array<i64: 36, 8>}, {pipeline_mode = #tpu.pipeline_mode<synchronous>, transform_indices = @transform_2, window_bounds = array<i64: 1, 8>}, {pipeline_mode = #tpu.pipeline_mode<synchronous>, transform_indices = @transform_3, window_bounds = array<i64: 8, 128>}, {pipeline_mode = #tpu.pipeline_mode<synchronous>, transform_indices = @transform_4, window_bounds = array<i64: 1, 128>}, {transform_indices = @transform_5, window_bounds = array<i64: 1, 128, 128>}]} {
    %c0 = arith.constant 0 : index
    %c0_0 = arith.constant 0 : index
    %c0_1 = arith.constant 0 : index
    %0 = vector.load %arg2[%c0, %c0_0, %c0_1] : memref<1x128x36xbf16, #tpu.memory_space<vmem>>, vector<1x128x36xbf16>
    %1 = vector.shape_cast %0 : vector<1x128x36xbf16> to vector<128x36xbf16>
    %c0_2 = arith.constant 0 : index
    %c0_3 = arith.constant 0 : index
    %2 = vector.load %arg3[%c0_2, %c0_3] : memref<36x8xbf16, #tpu.memory_space<vmem>>, vector<36x8xbf16>
    %cst = arith.constant dense<0.000000e+00> : vector<128x8xf32>
    %3 = tpu.matmul %1, %2, %cst {dimension_numbers = #tpu.dot_dimension_numbers<[1], [0], [0], [1], [0, 0, 1, 1], [], []>} : vector<128x36xbf16>, vector<36x8xbf16>, vector<128x8xf32> -> vector<128x8xf32>
    %c0_4 = arith.constant 0 : index
    %c0_5 = arith.constant 0 : index
    %4 = vector.load %arg4[%c0_4, %c0_5] : memref<1x8xf32, #tpu.memory_space<vmem>>, vector<1x8xf32>
    %5 = vector.broadcast %4 : vector<1x8xf32> to vector<128x8xf32>
    %6 = arith.addf %3, %5 : vector<128x8xf32>
    %cst_6 = arith.constant 1.000000e-01 : f32
    %7 = vector.broadcast %cst_6 : f32 to vector<128x8xf32>
    %8 = arith.mulf %7, %6 : vector<128x8xf32>
    %9 = arith.maximumf %6, %8 : vector<128x8xf32>
    %10 = arith.truncf %9 : vector<128x8xf32> to vector<128x8xbf16>
    %c0_7 = arith.constant 0 : index
    %c0_8 = arith.constant 0 : index
    %11 = vector.load %arg5[%c0_7, %c0_8] : memref<8x128xbf16, #tpu.memory_space<vmem>>, vector<8x128xbf16>
    %cst_9 = arith.constant dense<0.000000e+00> : vector<128x128xf32>
    %12 = tpu.matmul %10, %11, %cst_9 {dimension_numbers = #tpu.dot_dimension_numbers<[1], [0], [0], [1], [0, 0, 1, 1], [], []>} : vector<128x8xbf16>, vector<8x128xbf16>, vector<128x128xf32> -> vector<128x128xf32>
    %c0_10 = arith.constant 0 : index
    %c0_11 = arith.constant 0 : index
    %13 = vector.load %arg6[%c0_10, %c0_11] : memref<1x128xf32, #tpu.memory_space<vmem>>, vector<1x128xf32>
    %14 = vector.broadcast %13 : vector<1x128xf32> to vector<128x128xf32>
    %15 = arith.addf %12, %14 : vector<128x128xf32>
    %c0_12 = arith.constant 0 : index
    %c0_13 = arith.constant 0 : index
    %c0_14 = arith.constant 0 : index
    %16 = vector.load %arg7[%c0_12, %c0_13, %c0_14] : memref<1x128x128xf32, #tpu.memory_space<vmem>>, vector<1x128x128xf32>
    %17 = vector.shape_cast %16 : vector<1x128x128xf32> to vector<128x128xf32>
    %18 = vector.shape_cast %15 : vector<128x128xf32> to vector<1x128x128xf32>
    tpu.vector_store %arg7[%c0_12, %c0_13, %c0_14], %18 {strides = array<i32>} : memref<1x128x128xf32, #tpu.memory_space<vmem>>, vector<1x128x128xf32>,
    return
  }
  func.func @transform_0(%arg0: i32, %arg1: i32) -> (i32, i32, i32) {
    %c0_i32 = arith.constant 0 : i32
    %c0_i32_0 = arith.constant 0 : i32
    return %arg0, %arg1, %c0_i32 : i32, i32, i32
  }
  func.func @transform_1(%arg0: i32, %arg1: i32) -> (i32, i32) {
    %c0_i32 = arith.constant 0 : i32
    %c0_i32_0 = arith.constant 0 : i32
    %c0_i32_1 = arith.constant 0 : i32
    return %c0_i32, %c0_i32_0 : i32, i32
  }
  func.func @transform_2(%arg0: i32, %arg1: i32) -> (i32, i32) {
    %c0_i32 = arith.constant 0 : i32
    %c0_i32_0 = arith.constant 0 : i32
    %c0_i32_1 = arith.constant 0 : i32
    return %c0_i32, %c0_i32_0 : i32, i32
  }
  func.func @transform_3(%arg0: i32, %arg1: i32) -> (i32, i32) {
    %c0_i32 = arith.constant 0 : i32
    %c0_i32_0 = arith.constant 0 : i32
    %c0_i32_1 = arith.constant 0 : i32
    return %c0_i32, %c0_i32_0 : i32, i32
  }
  func.func @transform_4(%arg0: i32, %arg1: i32) -> (i32, i32) {
    %c0_i32 = arith.constant 0 : i32
    %c0_i32_0 = arith.constant 0 : i32
    %c0_i32_1 = arith.constant 0 : i32
    return %c0_i32, %c0_i32_0 : i32, i32
  }
  func.func @transform_5(%arg0: i32, %arg1: i32) -> (i32, i32, i32) {
    %c0_i32 = arith.constant 0 : i32
    %c0_i32_0 = arith.constant 0 : i32
    return %arg0, %arg1, %c0_i32 : i32, i32, i32
  }
}

</mosaic_0001>

<bundles_post_ra>
// kernel: tpu_custom_call.1
= control target key start
LH: loop header
LB: loop body
LE: loop exit
PB: predicated region body
PF: predicated region fallthrough
CT: control target
= control target key end

     0   :  { %10 = vsyncpa [#allocation3], 0  ;;  %s1132_s0 = inlined_call_operand.vmem [shape: bf16[2,256,36], index: 0, kind: input, shape index: {}]   ;;  %s1133_s1 = inlined_call_operand.vmem [shape: bf16[36,8], index: 1, kind: input, shape index: {}]   ;;  %s1134_s2 = inlined_call_operand.vmem [shape: f32[1,8], index: 2, kind: input, shape index: {}]   ;;  %s1135_s3 = inlined_call_operand.vmem [shape: bf16[8,128], index: 3, kind: input, shape index: {}]   ;;  %s1136_s4 = inlined_call_operand.vmem [shape: f32[1,128], index: 4, kind: input, shape index: {}]   ;;  %s1137_s5 = inlined_call_operand.hbm [shape: f32[2,256,128], index: 5, kind: output, shape index: {}]  }
   0x1   :  { %12 = vsyncpa [#allocation3 + $0x1], 0  ;;  %s940_s18 = smov 0   ;;  %s942_s19 = smov 0  }
   0x2   :  { %s944_s20 = smov 0   ;;  %s946_s21 = smov 0  }
   0x3   :  { %s948_s22 = smov 0   ;;  %s950_s23 = smov 0  }
   0x4   :  { %s952_s24 = smov 0   ;;  %s954_s25 = smov 0  }
   0x5 LB: > { %s652_s26 = sadd.s32 4294967295, %s906_s25   ;;  %s653_s27 = sadd.s32 4294967294, %s906_s25   ;;  %s906_s25 = sphi %s954_s25, %s18_s25   ;;  %s902_s24 = sphi %s952_s24, %s1146_s24   ;;  %s898_s23 = sphi %s950_s23, %s1145_s23   ;;  %s894_s22 = sphi %s948_s22, %s1144_s22   ;;  %s890_s21 = sphi %s946_s21, %s1143_s21   ;;  %s886_s20 = sphi %s944_s20, %s1142_s20   ;;  %s882_s19 = sphi %s942_s19, %s1141_s19   ;;  %s878_s18 = sphi %s940_s18, %s1140_s18  }
   0x6   : > { %s27_s28 = sadd.s32 1, %s898_s23  ;;  %s30_s29 = sadd.s32 1, %s902_s24 }
   0x7   : > { %p28_p0 = scmp.ge.s32.totalorder %s27_s28, 2  ;;  %p161_p1 = scmp.ne.s32.totalorder %s886_s20, %s882_s19 }
   0x8   : > { %p162_p2 = scmp.eq.s32.totalorder %s652_s26, 3  ;;  %p167_p5 = scmp.ne.s32.totalorder %s882_s19, %s878_s18 }
   0x9   : > { %s1148_s28 = smov (%p28_p0, %s27_s28), 0  ;;  %s1150_s29 = smov (!%p28_p0, %s30_s29), %s902_s24 }
   0xa   : > { %s147_s30 = ssub.s32 %s898_s23, %s1148_s28  ;;  %p991_p3 = por %p162_p2, %p161_p1 }
   0xb   : > { %p32_p4 = scmp.ge.s32.totalorder %s1150_s29, 2  ;;  %p168_p6 = scmp.eq.s32.totalorder %s653_s27, 3 }
   0xc   : > { %p656_p7 = scmp.ge.s32.totalorder %s906_s25, 1  ;;  %p211_p9 = scmp.lt.s32.totalorder %s906_s25, 5 }
   0xd   : > { %s1152_s29 = smov (%p32_p4, %s1150_s29), 0  ;;  %p1000_p8 = por %p168_p6, %p167_p5 }
   0xe   : > { %s146_s8 = ssub.s32 %s902_s24, %s1152_s29  ;;  %s151_s9 = sadd.s32 1, %s886_s20 }
   0xf   : > { %s148_s10 = sor.u32 %s147_s30, %s146_s8  ;;  %p212_p10 = pnand %p656_p7, %p211_p9 }
  0x10   : > { %p149_p11 = scmp.eq.s32.totalorder %s148_s10, 0  ;;  %s1015_s14 = sshll.u32 (!%p212_p10), %s890_s21, 4 }
  0x11   : > { %215 = sbr.rel (%p212_p10) target bundleno = 385 (0x181), region = 40  ;;  %p244_p12 = scmp.lt.s32.totalorder (!%p212_p10), %s894_s22, 1 }
  0x12   : > { %s1009_s11 = scalar_select %p149_p11, %s886_s20, %s151_s9  }
  0x13   : > { %p246_p13 = scmp.lt.s32.totalorder (!%p212_p10), %s1015_s14, 31  ;;  %s240_s27 = sand.u32 (!%p212_p10), 1, %s882_s19  }
  0x14   : > { %s719_s10 = sshll.u32 (!%p212_p10), %s894_s22, 5 }
  0x15   : > { %s564_s12 = sadd.s32 (!%p212_p10), %s719_s10, %s1015_s14 }
  0x16   : > { %v275_v0 = vld [vmem:[%s1133_s1 + $0x10] sm:$0x3]  ;;  %vm360_vm0 = vcmask 1041408   ;;  %s245_s15 = scalar_select %p244_p12, %s894_s22, 1  ;;  %v732_v4 = vld [vmem:[%s1133_s1 + $0x8] sm:$0xff]  ;;  %v731_v5 = vld [vmem:[%s1133_s1] sm:$0xff] }
  0x17   : > { %v329_v1 = vunpack.c.l.b16 %v275_v0  ;;  %s247_s16 = scalar_select %p246_p13, %s1015_s14, 31  ;;  %vm335_vm1 = vcmask 293888   ;;  %v453_v14 = vld [vmem:[%s1135_s3] sm:$0xf]  ;;  %vm483_vm2 = vcmask 1043456   ;;  %vm458_vm3 = vcmask 64512  }
  0x18   : > { %s659_s17 = sshll.u32 %s245_s15, 5  ;;  %v485_v15 = vsel %vm483_vm2, %v453_v14, 0  ;;  %v1036_v17 = vld [vmem:[%s1134_s2] ss:$0 sm:$0xff]  ;;  %s553_s14 = scalar_lea.sflag [#allocation3], %s240_s27 }
  0x19   : > { %v332_v2 = vpack.c.b16 %v329_v1, %v329_v1  ;;  %s249_s30 = sadd.s32 %s659_s17, %s247_s16  ;;  %494 = vmatpush.bf16.msra.mxu1 %v485_v15  ;;  %736 = vmatpush.bf16.msra.mxu3 %v485_v15 }
  0x1a   : > { %s660_s21 = sshll.u32 %s249_s30, 2  ;;  %s657_s30 = sshll.u32 %s240_s27, 7 }
  0x1b   : > { %v362_v3 = vsel %vm360_vm0, %v332_v2, 0  ;;  %s251_s13 = scalar_lea.vmem %s1132_s0, %s660_s21  ;;  %s1068_s9 = scalar_lea.vmem [#allocation2], %s657_s30 }
  0x1c   : > { %369 = vmatpush.bf16.msra.mxu0 %v362_v3  ;;  %733 = vmatpush.bf16.msra.mxu2 %v362_v3  ;;  %v723_v6 = vld [vmem:[%s251_s13] sm:$0xff]  ;;  %v724_v8 = vld [vmem:[%s251_s13 + $0x8] sm:$0xff]  ;;  %v725_v10 = vld [vmem:[%s251_s13 + $0x10] sm:$0xff]  ;;  %s567_s26 = sshll.u32 %s1068_s9, 4  ;;  %s568_s26 = int_to_ptr.vmem [resolvable:$true] %s567_s26 }
  0x1d   : > { %v727_v7 = vld [vmem:[%s251_s13 + $0x20] sm:$0xff]  ;;  %v728_v9 = vld [vmem:[%s251_s13 + $0x28] sm:$0xff]  ;;  %v729_v11 = vld [vmem:[%s251_s13 + $0x30] sm:$0xff] }
  0x1e   : > { %v726_v12 = vld [vmem:[%s251_s13 + $0x18] sm:$0xff] }
  0x1f   : > { %v730_v13 = vld [vmem:[%s251_s13 + $0x38] sm:$0xff]  ;;  %s720_s13 = sshll.u32 %s564_s12, 3  ;;  %s832_s12 = scalar_lea.hbm %s1137_s5, 512 }
  0x20   : > { %370 = vmatpush.bf16.msra.mxu0 %v732_v4  ;;  %734 = vmatpush.bf16.msra.mxu2 %v732_v4  ;;  %s566_s17 = scalar_lea.hbm %s1137_s5, %s720_s13 }
  0x21   : > { %s569_s22 = sshll.u32 %s566_s17, 4  ;;  %s570_s22 = int_to_ptr.hbm [resolvable:$true] %s569_s22 }
  0x22   : > { %s826_s30 = sshra.s32 %s570_s22, 4  ;;  %s827_s30 = int_to_ptr.hbm [resolvable:$true] %s826_s30 }
  0x23   : > { %s828_s21 = scalar_lea.hbm %s827_s30, 128  ;;  %p833_p4 = scmp.lt.s32.totalorder %s827_s30, %s1137_s5 }
  0x24   : > { %371 = vmatpush.bf16.msra.mxu0 %v731_v5  ;;  %735 = vmatpush.bf16.msra.mxu2 %v731_v5  ;;  %p829_p0 = scmp.ne.s32.totalorder %s827_s30, %s828_s21  ;;  %p834_p5 = scmp.lt.s32.totalorder %s832_s12, %s828_s21 }
  0x26   : > { %p830_p1 = pnand %p829_p0, %p991_p3  ;;  %p835_p6 = por %p834_p5, %p833_p4 }
  0x27   : > { %701 = vmatmul.msk.bf16.vlgmr.msra.gmra.mxu0 %vm335_vm1, %v723_v6  ;;  %705 = vmatmul.msk.bf16.vlgmr.msra.gmra.mxu2 %vm335_vm1, %v727_v7 }
  0x28   : > { %p831_p2 = pneg %p830_p1 }
  0x2a   : > { %p836_p7 = pnand %p835_p6, %p831_p2 }
  0x37   : > { %702 = vmatmul.msk.bf16.gmra.mxu0 %vm335_vm1, %v724_v8  ;;  %706 = vmatmul.msk.bf16.gmra.mxu2 %vm335_vm1, %v728_v9 }
  0x47   : > { %703 = vmatmul.msk.bf16.gmra.mxu0 %vm335_vm1, %v725_v10  ;;  %707 = vmatmul.msk.bf16.gmra.mxu2 %vm335_vm1, %v729_v11 }
  0x57   : > { %704 = vmatmul.msk.bf16.gmra.mxu0 %vm335_vm1, %v726_v12  ;;  %708 = vmatmul.msk.bf16.gmra.mxu2 %vm335_vm1, %v730_v13 }
  0xa4   : > { %v373_v16 = vpop.f32.mrf.mxu0 }
  0xa5   : > { %v374_v18 = vadd.f32 %v1036_v17, %v373_v16 }
  0xa7   : > { %v413_v22 = vmul.f32 0.1, %v374_v18 }
  0xa9   : > { %v429_v25 = vmax.f32 %v374_v18, %v413_v22 }
  0xaa   : > { %v393_v19 = vpop.f32.mrf.mxu2 }
  0xab   : > { %v394_v20 = vadd.f32 %v1036_v17, %v393_v19 }
  0xac   : > { %v375_v21 = vpop.f32.mrf.mxu0 }
  0xad   : > { %v376_v23 = vadd.f32 %v1036_v17, %v375_v21  ;;  %v421_v28 = vmul.f32 0.1, %v394_v20 }
  0xaf   : > { %v414_v24 = vmul.f32 0.1, %v376_v23  ;;  %v437_v33 = vmax.f32 %v394_v20, %v421_v28 }
  0xb1   : > { %v430_v26 = vmax.f32 %v376_v23, %v414_v24 }
  0xb2   : > { %v395_v27 = vpop.f32.mrf.mxu2 }
  0xb3   : > { %v396_v29 = vadd.f32 %v1036_v17, %v395_v27  ;;  %v445_v30 = vpack.c.bf16 %v430_v26, %v429_v25  ;;  %v811_v26 = vld [vmem:[%s1136_s4] ss:$0 sm:$0xff] }
  0xb4   : > { %v378_v31 = vpop.f32.mrf.mxu0 }
  0xb5   : > { %v422_v32 = vmul.f32 0.1, %v396_v29  ;;  %709 = vmatmul.msk.bf16.vlgmr.msra.gmra.mxu1 %vm458_vm3, %v445_v30  ;;  %v379_v35 = vadd.f32 %v1036_v17, %v378_v31 }
  0xb7   : > { %v438_v34 = vmax.f32 %v396_v29, %v422_v32  ;;  %v415_v39 = vmul.f32 0.1, %v379_v35 }
  0xb9   : > { %v449_v36 = vpack.c.bf16 %v438_v34, %v437_v33  ;;  %v431_v43 = vmax.f32 %v379_v35, %v415_v39 }
  0xba   : > { %v398_v37 = vpop.f32.mrf.mxu2 }
  0xbb   : > { %v399_v41 = vadd.f32 %v1036_v17, %v398_v37 }
  0xbc   : > { %v380_v38 = vpop.f32.mrf.mxu0 }
  0xbd   : > { %v381_v40 = vadd.f32 %v1036_v17, %v380_v38  ;;  %v423_v46 = vmul.f32 0.1, %v399_v41 }
  0xbf   : > { %v416_v42 = vmul.f32 0.1, %v381_v40  ;;  %v439_v51 = vmax.f32 %v399_v41, %v423_v46 }
  0xc1   : > { %v432_v44 = vmax.f32 %v381_v40, %v416_v42 }
  0xc2   : > { %v400_v45 = vpop.f32.mrf.mxu2 }
  0xc3   : > { %v401_v47 = vadd.f32 %v1036_v17, %v400_v45  ;;  %v446_v48 = vpack.c.bf16 %v432_v44, %v431_v43 }
  0xc4   : > { %v383_v49 = vpop.f32.mrf.mxu0 }
  0xc5   : > { %v424_v50 = vmul.f32 0.1, %v401_v47  ;;  %710 = vmatmul.msk.bf16.gmra.mxu1 %vm458_vm3, %v446_v48  ;;  %v384_v53 = vadd.f32 %v1036_v17, %v383_v49 }
  0xc7   : > { %v440_v52 = vmax.f32 %v401_v47, %v424_v50  ;;  %v417_v57 = vmul.f32 0.1, %v384_v53 }
  0xc9   : > { %v450_v54 = vpack.c.bf16 %v440_v52, %v439_v51  ;;  %v433_v61 = vmax.f32 %v384_v53, %v417_v57 }
  0xca   : > { %v403_v55 = vpop.f32.mrf.mxu2 }
  0xcb   : > { %714 = vmatmul.msk.bf16.vlgmr.msra.gmra.mxu3 %vm458_vm3, %v450_v54  ;;  %v404_v59 = vadd.f32 %v1036_v17, %v403_v55 }
  0xcc   : > { %v385_v56 = vpop.f32.mrf.mxu0 }
  0xcd   : > { %v386_v58 = vadd.f32 %v1036_v17, %v385_v56  ;;  %v425_v0 = vmul.f32 0.1, %v404_v59 }
  0xcf   : > { %v418_v60 = vmul.f32 0.1, %v386_v58  ;;  %v441_v5 = vmax.f32 %v404_v59, %v425_v0 }
  0xd1   : > { %v434_v62 = vmax.f32 %v386_v58, %v418_v60 }
  0xd2   : > { %v405_v63 = vpop.f32.mrf.mxu2 }
  0xd3   : > { %v406_v1 = vadd.f32 %v1036_v17, %v405_v63  ;;  %v447_v2 = vpack.c.bf16 %v434_v62, %v433_v61 }
  0xd4   : > { %v388_v3 = vpop.f32.mrf.mxu0 }
  0xd5   : > { %v426_v4 = vmul.f32 0.1, %v406_v1  ;;  %711 = vmatmul.msk.bf16.gmra.mxu1 %vm458_vm3, %v447_v2  ;;  %v389_v7 = vadd.f32 %v1036_v17, %v388_v3 }
  0xd7   : > { %v442_v6 = vmax.f32 %v406_v1, %v426_v4  ;;  %v419_v11 = vmul.f32 0.1, %v389_v7 }
  0xd9   : > { %v451_v8 = vpack.c.bf16 %v442_v6, %v441_v5  ;;  %v435_v15 = vmax.f32 %v389_v7, %v419_v11 }
  0xda   : > { %v408_v9 = vpop.f32.mrf.mxu2 }
  0xdb   : > { %715 = vmatmul.msk.bf16.gmra.mxu3 %vm458_vm3, %v451_v8  ;;  %v409_v13 = vadd.f32 %v1036_v17, %v408_v9 }
  0xdc   : > { %v390_v10 = vpop.f32.mrf.mxu0 }
  0xdd   : > { %v391_v12 = vadd.f32 %v1036_v17, %v390_v10  ;;  %v427_v19 = vmul.f32 0.1, %v409_v13 }
  0xdf   : > { %v420_v14 = vmul.f32 0.1, %v391_v12  ;;  %v443_v23 = vmax.f32 %v409_v13, %v427_v19 }
  0xe1   : > { %v436_v16 = vmax.f32 %v391_v12, %v420_v14 }
  0xe2   : > { %v410_v18 = vpop.f32.mrf.mxu2 }
  0xe3   : > { %v411_v20 = vadd.f32 %v1036_v17, %v410_v18  ;;  %v448_v21 = vpack.c.bf16 %v436_v16, %v435_v15 }
  0xe5   : > { %v428_v22 = vmul.f32 0.1, %v411_v20  ;;  %712 = vmatmul.msk.bf16.gmra.mxu1 %vm458_vm3, %v448_v21 }
  0xe7   : > { %v444_v24 = vmax.f32 %v411_v20, %v428_v22 }
  0xe9   : > { %v452_v25 = vpack.c.bf16 %v444_v24, %v443_v23 }
  0xeb   : > { %716 = vmatmul.msk.bf16.gmra.mxu3 %vm458_vm3, %v452_v25 }
  0xf5   : > { %713 = vmatmul.msk.bf16.gmra.mxu1 %vm458_vm3, %v449_v36 }
 0x132   : > { %v496_v27 = vpop.f32.mrf.mxu1 }
 0x133   : > { %v497_v17 = vadd.f32 %v811_v26, %v496_v27 }
 0x135   : > { %536 = vst [vmem:[%s1068_s9] sm:$0xff] %v497_v17 }
 0x13a   : > { %v498_v28 = vpop.f32.mrf.mxu1 }
 0x13b   : > { %v499_v29 = vadd.f32 %v811_v26, %v498_v28 }
 0x13d   : > { %537 = vst [vmem:[%s1068_s9 + $0x8] sm:$0xff] %v499_v29 }
 0x142   : > { %v501_v30 = vpop.f32.mrf.mxu1 }
 0x143   : > { %v502_v31 = vadd.f32 %v811_v26, %v501_v30 }
 0x145   : > { %538 = vst [vmem:[%s1068_s9 + $0x10] sm:$0xff] %v502_v31 }
 0x14a   : > { %v503_v32 = vpop.f32.mrf.mxu1 }
 0x14b   : > { %v504_v33 = vadd.f32 %v811_v26, %v503_v32 }
 0x14d   : > { %539 = vst [vmem:[%s1068_s9 + $0x18] sm:$0xff] %v504_v33 }
 0x14e   : > { %v521_v34 = vpop.f32.mrf.mxu3 }
 0x14f   : > { %v522_v35 = vadd.f32 %v811_v26, %v521_v34 }
 0x151   : > { %546 = vst [vmem:[%s1068_s9 + $0x50] sm:$0xff] %v522_v35 }
 0x152   : > { %v506_v36 = vpop.f32.mrf.mxu1 }
 0x153   : > { %v507_v37 = vadd.f32 %v811_v26, %v506_v36 }
 0x155   : > { %540 = vst [vmem:[%s1068_s9 + $0x20] sm:$0xff] %v507_v37 }
 0x156   : > { %v523_v38 = vpop.f32.mrf.mxu3 }
 0x157   : > { %v524_v39 = vadd.f32 %v811_v26, %v523_v38 }
 0x159   : > { %547 = vst [vmem:[%s1068_s9 + $0x58] sm:$0xff] %v524_v39 }
 0x15a   : > { %v508_v40 = vpop.f32.mrf.mxu1 }
 0x15b   : > { %v509_v41 = vadd.f32 %v811_v26, %v508_v40 }
 0x15d   : > { %541 = vst [vmem:[%s1068_s9 + $0x28] sm:$0xff] %v509_v41 }
 0x15e   : > { %v526_v42 = vpop.f32.mrf.mxu3 }
 0x15f   : > { %v527_v43 = vadd.f32 %v811_v26, %v526_v42 }
 0x161   : > { %548 = vst [vmem:[%s1068_s9 + $0x60] sm:$0xff] %v527_v43 }
 0x162   : > { %v511_v44 = vpop.f32.mrf.mxu1 }
 0x163   : > { %v512_v45 = vadd.f32 %v811_v26, %v511_v44 }
 0x165   : > { %542 = vst [vmem:[%s1068_s9 + $0x30] sm:$0xff] %v512_v45 }
 0x166   : > { %v528_v46 = vpop.f32.mrf.mxu3 }
 0x167   : > { %v529_v47 = vadd.f32 %v811_v26, %v528_v46 }
 0x169   : > { %549 = vst [vmem:[%s1068_s9 + $0x68] sm:$0xff] %v529_v47 }
 0x16a   : > { %v513_v48 = vpop.f32.mrf.mxu1 }
 0x16b   : > { %v514_v49 = vadd.f32 %v811_v26, %v513_v48 }
 0x16d   : > { %543 = vst [vmem:[%s1068_s9 + $0x38] sm:$0xff] %v514_v49 }
 0x16e   : > { %v531_v50 = vpop.f32.mrf.mxu3 }
 0x16f   : > { %v532_v51 = vadd.f32 %v811_v26, %v531_v50 }
 0x171   : > { %550 = vst [vmem:[%s1068_s9 + $0x70] sm:$0xff] %v532_v51 }
 0x172   : > { %v516_v52 = vpop.f32.mrf.mxu1 }
 0x173   : > { %v517_v53 = vadd.f32 %v811_v26, %v516_v52 }
 0x175   : > { %544 = vst [vmem:[%s1068_s9 + $0x40] sm:$0xff] %v517_v53 }
 0x176   : > { %v533_v54 = vpop.f32.mrf.mxu3 }
 0x177   : > { %v534_v55 = vadd.f32 %v811_v26, %v533_v54 }
 0x179   : > { %551 = vst [vmem:[%s1068_s9 + $0x78] sm:$0xff] %v534_v55 }
 0x17a   : > { %v518_v56 = vpop.f32.mrf.mxu1 }
 0x17b   : > { %v519_v57 = vadd.f32 %v811_v26, %v518_v56 }
 0x17d   : > { %545 = vst [vmem:[%s1068_s9 + $0x48] sm:$0xff] %v519_v57 }
 0x17e   : > { %839 = shalt.err (!%p836_p7)
}
 0x17f   : > { %s908_s27 = smov 128   ;;  %s909_s9 = smov 8  }
 0x180   : > { %737 = dma.vmem_to_hbm [thread:$0]  (%p991_p3), %s568_s26, 2048, %s570_s22, %s553_s14, %s908_s27, %s908_s27, %s909_s9  }
 0x181 PF: > { %p743_p9 = scmp.ge.s32.totalorder %s906_s25, 2  ;;  %s584_s16 = sand.u32 1, %s878_s18  }
 0x182   : > { %s585_s17 = scalar_lea.sflag [#allocation3], %s584_s16 }
 0x183   : > { %p740_p10 = pnand %p743_p9, %p1000_p8 }
 0x185   : > { %p741_p11 = pneg %p740_p10 }
 0x187   : > { %873 = dma.done.wait (%p741_p11), %s585_s17, 2048  }
 0x188   : > { %875 = vsyncadd (%p741_p11), %s585_s17, 4294965248  ;;  %s18_s25 = sadd.s32 1, %s906_s25   ;;  %s1140_s18 = smov %s882_s19 }
 0x189   : > { %p15_p12 = scmp.ge.s32.totalorder %s18_s25, 6   ;;  %s1141_s19 = smov %s886_s20 }
 0x18a   : > { %s1142_s20 = smov %s1009_s11  ;;  %s1143_s21 = smov %s898_s23 }
 0x18b   : > { %s1144_s22 = smov %s902_s24  ;;  %s1145_s23 = smov %s1148_s28 }
 0x18c   : > { %s1146_s24 = smov %s1152_s29  ;;  %17 = sbr.rel (!%p15_p12) target bundleno = 5 (0x5), region = 75 }
 0x191   :  { %591 = vsyncpa [#allocation3], 1 }
 0x192   :  { %593 = vsyncpa [#allocation3 + $0x1], 1 }

</bundles_post_ra>
